<compile_context>
chip_gen: v6e
topology: v6e:2x2x1
jax: 0.10.0
libtpu: 0.0.40
codegen_flags: <defaults>
</compile_context>

<pallas_src>
import jax
import jax.numpy as jnp
from jax.experimental import pallas as pl
from jax.experimental.pallas import tpu as pltpu

EPS = 1e-6


def layernorm_kernel(alpha_ref, bias_ref, x_ref, o_ref):
    # x_ref: (TM, H) tile in VMEM; alpha/bias: (1,) scalar params in SMEM.
    out_dtype = o_ref.dtype
    x = x_ref[...].astype(jnp.float32)
    n = x.shape[-1]

    mean = jnp.mean(x, axis=-1, keepdims=True)
    diff = x - mean
    # torch.std defaults to the UNBIASED estimator (divide by N-1); eps is
    # added to std OUTSIDE the sqrt, exactly as in the PyTorch module.
    # (H == 1 yields nan, same as torch.std with ddof=1.)
    var = jnp.sum(diff * diff, axis=-1, keepdims=True) / jnp.float32(n - 1)
    denom = jnp.sqrt(var) + jnp.float32(EPS)                 # (TM, 1)

    # EUP approx reciprocal (idle slot in this kernel) + one Newton-Raphson
    # step to recover ~full f32 accuracy; only TM values per tile.
    inv = pl.reciprocal(denom, approx=True)
    inv = inv * (jnp.float32(2.0) - denom * inv)             # (TM, 1)
    scale = alpha_ref[0].astype(jnp.float32) * inv           # (TM, 1)

    if out_dtype == jnp.bfloat16:
        # Lean bf16 tail (bf16 VALU on v6e/v7x); stats above stay f32.
        y = (diff.astype(out_dtype) * scale.astype(out_dtype)
             + bias_ref[0].astype(out_dtype))
        o_ref[...] = y
    else:
        y = diff * scale + bias_ref[0].astype(jnp.float32)
        o_ref[...] = y.astype(out_dtype)


def _vmem_budget_and_limit():
    """Generation-aware (budget_bytes_for_tiling, vmem_limit_bytes)."""
    cap = 64 * 1024 * 1024  # conservative default = v7x per-TC VMEM
    try:
        cap = int(getattr(pltpu.get_tpu_info(), "vmem_capacity_bytes", cap)) or cap
    except Exception:
        pass
    budget = cap // 3          # working-set budget used to size tiles
    limit = (cap // 4) * 3     # scoped-VMEM limit passed to the compiler
    return budget, limit


def _pick_tile_rows(num_rows, hidden, itemsize, budget_bytes):
    """Largest sublane-aligned row tile whose working set fits the budget."""
    # Native sublane pack factor: 8 (f32), 16 (bf16/f16), 32 (int8/fp8).
    sub = max(8, 32 // max(int(itemsize), 1))
    # Working set per row: double-buffered input + output tiles (2+2 buffers of
    # the storage dtype) plus ~3 f32 temporaries for the in-kernel upcast/math.
    bytes_per_row = hidden * (4 * itemsize + 12)

    t = budget_bytes // max(bytes_per_row, 1)
    t = (t // sub) * sub
    if t < sub:
        raise ValueError(
            f"LayerNorm hidden size {hidden} too large for a single "
            f"{sub}-row tile within the ~{budget_bytes >> 20} MiB VMEM budget; "
            "an H-chunked reduction path is not implemented."
        )

    rows_up = ((num_rows + sub - 1) // sub) * sub
    if t >= rows_up:
        # Whole array fits in one tile. Keep at least 2 grid steps when there
        # is more than one sublane group of rows so the "parallel" axis can be
        # split across v7x's two TensorCores (harmless on v5e/v6e).
        if rows_up > sub:
            half = (((num_rows + 1) // 2) + sub - 1) // sub * sub
            t = max(sub, min(half, rows_up))
        else:
            t = rows_up
    return int(t)


def layer_normalization(x, alpha, bias, *, tile_rows=None):
    """x: (..., H). alpha, bias: shape (1,) scalar parameters (as in the module)."""
    orig_shape = x.shape
    H = orig_shape[-1]
    x2d = x.reshape(-1, H)
    R = x2d.shape[0]

    budget_bytes, vmem_limit = _vmem_budget_and_limit()
    if tile_rows is None:
        tile_rows = _pick_tile_rows(R, H, x2d.dtype.itemsize, budget_bytes)

    grid = (pl.cdiv(R, tile_rows),)

    out = pl.pallas_call(
        layernorm_kernel,
        out_shape=jax.ShapeDtypeStruct((R, H), x.dtype),
        grid_spec=pltpu.PrefetchScalarGridSpec(
            num_scalar_prefetch=0,
            grid=grid,
            in_specs=[
                pl.BlockSpec(memory_space=pltpu.MemorySpace.SMEM),  # alpha (1,)
                pl.BlockSpec(memory_space=pltpu.MemorySpace.SMEM),  # bias  (1,)
                pl.BlockSpec((tile_rows, H), lambda i: (i, 0)),
            ],
            out_specs=pl.BlockSpec((tile_rows, H), lambda i: (i, 0)),
        ),
        compiler_params=pltpu.CompilerParams(
            dimension_semantics=("parallel",),   # rows independent; v7x megacore
            vmem_limit_bytes=int(vmem_limit),
        ),
    )(alpha, bias, x2d)

    return out.reshape(orig_shape)


def layer_normalization_ref(x, alpha, bias):
    mean = jnp.mean(x, axis=-1, keepdims=True)
    std = jnp.std(x, axis=-1, keepdims=True, ddof=1)  # unbiased, like torch.std
    return alpha * (x - mean) / (std + EPS) + bias


if __name__ == "__main__":
    key = jax.random.PRNGKey(0)
    B, S, H = 2, 8, 32
    x = jax.random.normal(key, (B, S, H), dtype=jnp.float32)

    # Deterministic parameter init matching nn.Parameter(torch.ones(1)) / zeros(1).
    alpha = jnp.ones((1,), dtype=jnp.float32)
    bias = jnp.zeros((1,), dtype=jnp.float32)

    out = layer_normalization(x, alpha, bias)
    out = jax.block_until_ready(out)

    ref = layer_normalization_ref(x, alpha, bias)
    assert out.shape == x.shape and out.dtype == x.dtype
    assert jnp.allclose(out, ref, atol=1e-5, rtol=1e-5), "mismatch vs reference"

    print("KERNEL_OK")
</pallas_src>

<mosaic_0001>
module attributes {stable_mosaic.version = 11 : i64} {
  func.func @layernorm_kernel(%arg0: i32, %arg1: memref<1xf32, #tpu.memory_space<smem>>, %arg2: memref<1xf32, #tpu.memory_space<smem>>, %arg3: memref<8x32xf32, #tpu.memory_space<vmem>>, %arg4: memref<8x32xf32, #tpu.memory_space<vmem>>) attributes {dimension_semantics = [#tpu.dimension_semantics<parallel>], iteration_bounds = array<i64: 2>, scalar_prefetch = 0 : i64, scratch_operands = 0 : i64, tpu.core_type = #tpu.core_type<tc>, window_params = [{transform_indices = @transform_0, window_bounds = array<i64: 1>}, {transform_indices = @transform_1, window_bounds = array<i64: 1>}, {transform_indices = @transform_2, window_bounds = array<i64: 8, 32>}, {transform_indices = @transform_3, window_bounds = array<i64: 8, 32>}]} {
    %c0 = arith.constant 0 : index
    %c0_0 = arith.constant 0 : index
    %0 = vector.load %arg3[%c0, %c0_0] : memref<8x32xf32, #tpu.memory_space<vmem>>, vector<8x32xf32>
    %cst = arith.constant dense<0.000000e+00> : vector<8xf32>
    %1 = vector.multi_reduction <add>, %0, %cst [1] : vector<8x32xf32> to vector<8xf32>
    %2 = vector.shape_cast %1 : vector<8xf32> to vector<8x1xf32>
    %cst_1 = arith.constant 3.200000e+01 : f32
    %3 = vector.broadcast %cst_1 : f32 to vector<8x1xf32>
    %4 = arith.divf %2, %3 : vector<8x1xf32>
    %5 = vector.broadcast %4 : vector<8x1xf32> to vector<8x32xf32>
    %6 = arith.subf %0, %5 : vector<8x32xf32>
    %7 = arith.mulf %6, %6 : vector<8x32xf32>
    %cst_2 = arith.constant dense<0.000000e+00> : vector<8xf32>
    %8 = vector.multi_reduction <add>, %7, %cst_2 [1] : vector<8x32xf32> to vector<8xf32>
    %9 = vector.shape_cast %8 : vector<8xf32> to vector<8x1xf32>
    %cst_3 = arith.constant 3.100000e+01 : f32
    %10 = vector.broadcast %cst_3 : f32 to vector<8x1xf32>
    %11 = arith.divf %9, %10 : vector<8x1xf32>
    %12 = math.sqrt %11 : vector<8x1xf32>
    %cst_4 = arith.constant 9.99999997E-7 : f32
    %13 = vector.broadcast %cst_4 : f32 to vector<8x1xf32>
    %14 = arith.addf %12, %13 : vector<8x1xf32>
    %15 = tpu.reciprocal %14 {approx = true} : vector<8x1xf32> -> vector<8x1xf32>
    %16 = arith.mulf %14, %15 : vector<8x1xf32>
    %cst_5 = arith.constant 2.000000e+00 : f32
    %17 = vector.broadcast %cst_5 : f32 to vector<8x1xf32>
    %18 = arith.subf %17, %16 : vector<8x1xf32>
    %19 = arith.mulf %15, %18 : vector<8x1xf32>
    %c0_6 = arith.constant 0 : index
    %20 = memref.load %arg1[%c0_6] : memref<1xf32, #tpu.memory_space<smem>>
    %21 = vector.broadcast %20 : f32 to vector<8x1xf32>
    %22 = arith.mulf %21, %19 : vector<8x1xf32>
    %23 = vector.broadcast %22 : vector<8x1xf32> to vector<8x32xf32>
    %24 = arith.mulf %6, %23 : vector<8x32xf32>
    %c0_7 = arith.constant 0 : index
    %25 = memref.load %arg2[%c0_7] : memref<1xf32, #tpu.memory_space<smem>>
    %26 = vector.broadcast %25 : f32 to vector<8x32xf32>
    %27 = arith.addf %24, %26 : vector<8x32xf32>
    %c0_8 = arith.constant 0 : index
    %c0_9 = arith.constant 0 : index
    %28 = vector.load %arg4[%c0_8, %c0_9] : memref<8x32xf32, #tpu.memory_space<vmem>>, vector<8x32xf32>
    tpu.vector_store %arg4[%c0_8, %c0_9], %27 {strides = array<i32>} : memref<8x32xf32, #tpu.memory_space<vmem>>, vector<8x32xf32>,
    return
  }
  func.func @transform_0(%arg0: i32) -> i32 {
    %c0_i32 = arith.constant 0 : i32
    %c0_i32_0 = arith.constant 0 : i32
    return %c0_i32 : i32
  }
  func.func @transform_1(%arg0: i32) -> i32 {
    %c0_i32 = arith.constant 0 : i32
    %c0_i32_0 = arith.constant 0 : i32
    return %c0_i32 : i32
  }
  func.func @transform_2(%arg0: i32) -> (i32, i32) {
    %c0_i32 = arith.constant 0 : i32
    %c0_i32_0 = arith.constant 0 : i32
    return %arg0, %c0_i32 : i32, i32
  }
  func.func @transform_3(%arg0: i32) -> (i32, i32) {
    %c0_i32 = arith.constant 0 : i32
    %c0_i32_0 = arith.constant 0 : i32
    return %arg0, %c0_i32 : i32, i32
  }
}

</mosaic_0001>

<bundles_post_ra>
// kernel: tpu_custom_call.1
= control target key start
LH: loop header
LB: loop body
LE: loop exit
PB: predicated region body
PF: predicated region fallthrough
CT: control target
= control target key end

     0   :  { %s638_s0 = inlined_call_operand.<no memory space> [shape: f32[1], index: 0, kind: input, shape index: {}]   ;;  %s639_s1 = inlined_call_operand.<no memory space> [shape: f32[1], index: 1, kind: input, shape index: {}]   ;;  %s640_s2 = inlined_call_operand.hbm [shape: f32[16,32], index: 2, kind: input, shape index: {}]   ;;  %s641_s3 = inlined_call_operand.hbm [shape: f32[16,32], index: 3, kind: output, shape index: {}]  }
   0x1   :  { %8 = sst [smem:[#allocation2]] %s638_s0 }
   0x2   :  { %9 = sst [smem:[#allocation3]] %s639_s1 }
   0x3   :  { %10 = vsyncpa [#allocation5], 0 }
   0x4   :  { %12 = vsyncpa [#allocation5 + $0x1], 0 }
   0x5   :  { %13 = vsyncpa [#allocation6], 0 }
   0x6   :  { %15 = vsyncpa [#allocation6 + $0x1], 0  ;;  %s490_s16 = smov 0   ;;  %s492_s17 = smov 0  }
   0x7   :  { %s494_s18 = smov 0   ;;  %s496_s19 = smov 0  }
   0x8 LB: > { %s511_s0 = sadd.s32 4294967295, %s460_s19   ;;  %s306_s1 = sadd.s32 4294967294, %s460_s19   ;;  %s460_s19 = sphi %s496_s19, %s658_s19   ;;  %s456_s18 = sphi %s494_s18, %s657_s18   ;;  %s452_s17 = sphi %s492_s17, %s656_s17   ;;  %s448_s16 = sphi %s490_s16, %s655_s16  }
   0x9   : > { %s515_s20 = sadd.s32 1, %s460_s19   ;;  %s70_s21 = sadd.s32 1, %s456_s18 }
   0xa   : > { %s67_s22 = ssub.s32 %s460_s19, %s515_s20  ;;  %p77_p0 = scmp.ne.s32.totalorder %s456_s18, %s452_s17 }
   0xb   : > { %p68_p1 = scmp.eq.s32.totalorder %s67_s22, 0  ;;  %p78_p2 = scmp.eq.s32.totalorder %s460_s19, 0 }
   0xc   : > { %p83_p3 = scmp.ne.s32.totalorder %s452_s17, %s448_s16  ;;  %p84_p4 = scmp.eq.s32.totalorder %s511_s0, 0 }
   0xd   : > { %s527_s23 = scalar_select %p68_p1, %s456_s18, %s70_s21  }
   0xe   : > { %p529_p5 = por %p78_p2, %p77_p0  ;;  %p533_p6 = por %p84_p4, %p83_p3 }
   0xf   : > { %p107_p7 = scmp.eq.s32.totalorder %s511_s0, 1  ;;  %p113_p8 = scmp.eq.s32.totalorder %s306_s1, 1 }
  0x10   : > { %s645_s25 = scalar_select %p533_p6, 1, 0 }
  0x11   : > { %p330_p10 = scmp.lt.s32.totalorder %s460_s19, 2  ;;  %p540_p11 = por %p107_p7, %p77_p0 }
  0x12   : > { %p544_p12 = por %p113_p8, %p83_p3  ;;  %s139_s28 = sand.u32 1, %s456_s18  }
  0x13   : > { %s646_s26 = scalar_select %p540_p11, 1, 0 }
  0x14   : > { %s647_s27 = scalar_select %p544_p12, 1, 0 }
  0x15   : > { %s310_s29 = sshll.u32 %s460_s19, 7  ;;  %s309_s30 = sshll.u32 %s139_s28, 3 }
  0x16   : > { %s553_s6 = scalar_lea.hbm %s640_s2, %s310_s29  ;;  %s143_s7 = scalar_lea.vmem [#allocation4], %s309_s30 }
  0x17   : > { %s150_s8 = sshll.u32 %s143_s7, 4  ;;  %p557_p13 = pnand %p330_p10, %p529_p5  ;;  %s561_s8 = int_to_ptr.vmem [resolvable:$true] %s150_s8 }
  0x18   : > { %s140_s10 = scalar_lea.sflag [#allocation5], %s139_s28  ;;  %s368_s11 = scalar_lea.hbm %s553_s6, 128 }
  0x19   : > { %p369_p2 = scmp.ne.s32.totalorder %s553_s6, %s368_s11  ;;  %p370_p3 = pneg %p557_p13 }
  0x1a   : > { %s373_s14 = scalar_lea.hbm %s640_s2, 256  ;;  %p374_p5 = scmp.lt.s32.totalorder %s553_s6, %s640_s2 }
  0x1b   : > { %p371_p4 = pnand %p370_p3, %p369_p2  ;;  %p375_p8 = scmp.lt.s32.totalorder %s373_s14, %s368_s11 }
  0x1d   : > { %p372_p7 = pneg %p371_p4  ;;  %p376_p10 = por %p375_p8, %p374_p5 }
  0x1f   : > { %p377_p9 = pnand %p376_p10, %p372_p7 }
  0x21   : > { %380 = shalt.err (!%p377_p9)
}
  0x22   : > { %s381_s21 = scalar_lea.vmem %s561_s8, 128  ;;  %s462_s22 = smov [#allocation4]  }
  0x23   : > { %p382_p0 = scmp.ne.s32.totalorder %s561_s8, %s381_s21  ;;  %s386_s24 = sshll.u32 %s462_s22, 4  ;;  %s387_s24 = int_to_ptr.vmem [resolvable:$false] %s386_s24 }
  0x24   : > { %s388_s28 = scalar_lea.vmem %s387_s24, 256  ;;  %p389_p4 = scmp.lt.s32.totalorder %s561_s8, %s387_s24 }
  0x25   : > { %p384_p1 = pnand %p382_p0, %p370_p3  ;;  %p390_p12 = scmp.lt.s32.totalorder %s388_s28, %s381_s21 }
  0x27   : > { %p385_p2 = pneg %p384_p1  ;;  %p391_p11 = por %p390_p12, %p389_p4 }
  0x29   : > { %p392_p6 = pnand %p391_p11, %p385_p2 }
  0x2b   : > { %395 = shalt.err (!%p392_p6)
}
  0x2c   : > { %325 = dma.hbm_to_vmem [thread:$0]  (!%p557_p13), %s553_s6, 128, %s561_s8, %s140_s10  }
  0x2d   : > { %p649_p9 = scmp.lt.s32.totalorder %s460_s19, 3  ;;  %p650_p7 = scmp.ge.s32.totalorder %s460_s19, 1 }
  0x2f   : > { %p156_p0 = pnand %p650_p7, %p649_p9 }
  0x30   : > { %s588_s29 = sand.u32 (!%p156_p0), 1, %s452_s17   ;;  %p651_p6 = scmp.ne.s32.totalorder (!%p156_p0), %s645_s25, 0 }
  0x31   : > { %159 = sbr.rel (%p156_p0) target bundleno = 401 (0x191), region = 32  ;;  %s312_s30 = sshll.u32 (!%p156_p0), %s588_s29, 3 }
  0x32   : > { %s162_s4 = scalar_lea.sflag (!%p156_p0), [#allocation5], %s588_s29  ;;  %s165_s5 = scalar_lea.vmem (!%p156_p0), [#allocation4], %s312_s30 }
  0x36   : > { %439 = dma.done.wait (%p651_p6), %s162_s4, 128  }
  0x37   : > { %441 = vsyncadd (%p651_p6), %s162_s4, 4294967168  ;;  %vm189_vm0 = vcmask 261120   ;;  %v188_v0 = vld [vmem:[%s165_s5] sm:$0xff]  ;;  %s214_s25 = sld [smem:[#allocation2]]  ;;  %s315_s7 = sshll.u32 %s511_s0, 7 }
  0x38   : > { %v190_v1 = vsel %vm189_vm0, %v188_v0, 0.0  ;;  %s218_s6 = sld [smem:[#allocation3]]  ;;  %s187_s8 = scalar_lea.vmem [#allocation7], %s312_s30 }
  0x39   : > { %191 = vadd.xlane.f32.xlu0 %v190_v1  ;;  %s236_s9 = sshll.u32 %s187_s8, 4  ;;  %s234_s12 = scalar_lea.hbm %s641_s3, %s315_s7  ;;  %s237_s9 = int_to_ptr.vmem [resolvable:$true] %s236_s9 }
  0x3a   : > { %s223_s13 = scalar_lea.sflag [#allocation6], %s588_s29  ;;  %s396_s14 = scalar_lea.vmem %s237_s9, 128 }
  0x3b   : > { %p397_p11 = scmp.ne.s32.totalorder %s237_s9, %s396_s14  ;;  %p652_p12 = scmp.ne.s32.totalorder %s646_s26, 0 }
  0x3c   : > { %s463_s15 = smov [#allocation7]  }
  0x3d   : > { %v215_v18 = vstv %s214_s25  ;;  %p398_p13 = pnand %p397_p11, %p652_p12  ;;  %s400_s0 = sshll.u32 %s463_s15, 4  ;;  %s401_s0 = int_to_ptr.vmem [resolvable:$false] %s400_s0 }
  0x3e   : > { %v219_v21 = vstv %s218_s6  ;;  %s402_s1 = scalar_lea.vmem %s401_s0, 256  ;;  %p403_p3 = scmp.lt.s32.totalorder %s237_s9, %s401_s0 }
  0x3f   : > { %p399_p1 = pneg %p398_p13  ;;  %p404_p5 = scmp.lt.s32.totalorder %s402_s1, %s396_s14 }
  0x41   : > { %p405_p8 = por %p404_p5, %p403_p3 }
  0x43   : > { %p406_p10 = pnand %p405_p8, %p399_p1 }
  0xc2   : > { %v192_v2 = vpop.xlane.xlu0 %191 }
  0xc3   : > { %v194_v3 = vmul.f32 0.03125, %v192_v2 }
  0xc5   : > { %v195_v4 = vsub.f32 %v188_v0, %v194_v3 }
  0xc7   : > { %v196_v5 = vmul.f32 %v195_v4, %v195_v4 }
  0xc9   : > { %v197_v6 = vsel %vm189_vm0, %v196_v5, 0.0 }
  0xca   : > { %198 = vadd.xlane.f32.xlu0 %v197_v6 }
 0x153   : > { %v199_v7 = vpop.xlane.xlu0 %198 }
 0x154   : > { %v201_v8 = vmul.f32 0.032258064, %v199_v7 }
 0x156   : > { %364 = vrsqrt.f32 %v201_v8  ;;  %vm204_vm1 = vcmp.eq.f32.partialorder %v201_v8, inf  ;;  %v207_v11 = vand.u32 2147483648, %v201_v8  ;;  %vm206_vm2 = vcmp.eq.f32.partialorder %v201_v8, 0.0 }
 0x163   : > { %v365_v9 = vpop.eup %364 }
 0x164   : > { %v203_v10 = vmul.f32 %v365_v9, %v201_v8 }
 0x166   : > { %v205_v12 = vsel %vm204_vm1, %v201_v8, %v203_v10 }
 0x167   : > { %v208_v13 = vsel %vm206_vm2, %v207_v11, %v205_v12 }
 0x168   : > { %v209_v14 = vadd.f32 1e-06, %v208_v13 }
 0x16a   : > { %366 = vrcp.f32 %v209_v14 }
 0x177   : > { %v367_v15 = vpop.eup %366 }
 0x178   : > { %v211_v16 = vmul.f32 %v367_v15, %v209_v14 }
 0x17a   : > { %v212_v17 = vsub.f32 2.0, %v211_v16 }
 0x17c   : > { %v213_v19 = vmul.f32 %v367_v15, %v212_v17 }
 0x17e   : > { %v216_v20 = vmul.f32 %v215_v18, %v213_v19 }
 0x180   : > { %v217_v22 = vmul.f32 %v216_v20, %v195_v4 }
 0x182   : > { %v220_v23 = vadd.f32 %v219_v21, %v217_v22 }
 0x184   : > { %221 = vst.msk [vmem:[%s187_s8] sm:$0xff] %vm189_vm0, %v220_v23 }
 0x185   : > { %409 = shalt.err (!%p406_p10)
}
 0x186   : > { %s410_s21 = scalar_lea.hbm %s234_s12, 128  ;;  %s414_s28 = scalar_lea.hbm %s641_s3, 256 }
 0x187   : > { %p411_p2 = scmp.ne.s32.totalorder %s234_s12, %s410_s21  ;;  %p415_p7 = scmp.lt.s32.totalorder %s234_s12, %s641_s3 }
 0x188   : > { %p416_p0 = scmp.lt.s32.totalorder %s414_s28, %s410_s21 }
 0x189   : > { %p412_p4 = pnand %p411_p2, %p652_p12 }
 0x18a   : > { %p417_p6 = por %p416_p0, %p415_p7 }
 0x18b   : > { %p413_p9 = pneg %p412_p4 }
 0x18d   : > { %p418_p11 = pnand %p417_p6, %p413_p9 }
 0x18f   : > { %421 = shalt.err (!%p418_p11)
}
 0x190   : > { %320 = dma.vmem_to_hbm [thread:$0]  (%p652_p12), %s237_s9, 128, %s234_s12, %s223_s13  }
 0x191 PF: > { %s248_s4 = sand.u32 1, %s448_s16   ;;  %p653_p13 = scmp.ne.s32.totalorder %s647_s27, 0 }
 0x192   : > { %p654_p1 = scmp.ge.s32.totalorder %s460_s19, 2  ;;  %s249_s5 = scalar_lea.sflag [#allocation6], %s248_s4 }
 0x194   : > { %p327_p3 = pnand %p654_p1, %p653_p13 }
 0x196   : > { %p328_p5 = pneg %p327_p3 }
 0x198   : > { %443 = dma.done.wait (%p328_p5), %s249_s5, 128  }
 0x199   : > { %445 = vsyncadd (%p328_p5), %s249_s5, 4294967168  ;;  %p18_p8 = scmp.ge.s32.totalorder %s515_s20, 4   ;;  %s655_s16 = smov %s452_s17 }
 0x19a   : > { %s656_s17 = smov %s456_s18  ;;  %s657_s18 = smov %s527_s23 }
 0x19b   : > { %s658_s19 = smov %s515_s20  ;;  %20 = sbr.rel (!%p18_p8) target bundleno = 8 (0x8), region = 77 }
 0x1a0   :  { %254 = vsyncpa [#allocation5], 1 }
 0x1a1   :  { %256 = vsyncpa [#allocation5 + $0x1], 1 }
 0x1a2   :  { %257 = vsyncpa [#allocation6], 1 }
 0x1a3   :  { %259 = vsyncpa [#allocation6 + $0x1], 1 }

</bundles_post_ra>
